<compile_context>
chip_gen: v7x
topology: tpu7x:2x2x1
jax: 0.10.0
libtpu: 0.0.40
codegen_flags: <defaults>
</compile_context>

<pallas_src>
import functools

import numpy as np
import jax
import jax.numpy as jnp
from jax.experimental import pallas as pl
from jax.experimental.pallas import tpu as pltpu


def affine_gaussian_kernel(c_ref, scale_ref, t_ref, eps_ref, z_ref, logp_ref):
    """One TILE_N-row block: z = eps*scale + t ; log_p = c - 0.5*sum(eps^2, axis=1)."""
    eps = eps_ref[...]                                            # (TILE_N, d)   VPU
    z_ref[...] = (eps * scale_ref[...] + t_ref[...]).astype(z_ref.dtype)
    quad = jnp.sum(eps * eps, axis=1, keepdims=True)              # (TILE_N, 1)   XLU reduce
    logp_ref[...] = (c_ref[0] - 0.5 * quad).astype(logp_ref.dtype)


def _ceil_to(x, m):
    return ((x + m - 1) // m) * m


@functools.partial(jax.jit, static_argnames=("log_scale", "tile_n"))
def affine_gaussian_forward(eps, s, t, *, log_scale=0.0, tile_n=1024):
    """AffineGaussian.forward given pre-drawn eps.

    eps : (num_samples,) + shape
    s, t: (1,) + affine_shape, broadcastable to (1,) + shape  (AffineConstFlow params)
    log_scale: np.log(temperature) or 0.0 (host-side float, as in the PyTorch module)
    """
    num_samples = eps.shape[0]
    shape = eps.shape[1:]
    d = int(np.prod(shape))

    # ---- parameter-only math: tiny, stays in plain XLA and fuses ----
    s_full = jnp.broadcast_to(s, (1,) + shape).reshape(1, d).astype(jnp.float32)
    t_full = jnp.broadcast_to(t, (1,) + shape).reshape(1, d).astype(jnp.float32)
    scale = jnp.exp(s_full + log_scale)                 # exp(log_scale) * exp(s), (1, d)
    log_det = jnp.sum(s_full)                           # == prod_batch_dims * sum(s)
    logp_const = (-0.5 * d * np.log(2.0 * np.pi) - d * log_scale) - log_det
    logp_const = logp_const.reshape(1).astype(jnp.float32)   # 1-D SMEM scalar

    # ---- sample-axis tiling (pad rows to a multiple of the tile) ----
    eps2d = eps.reshape(num_samples, d).astype(jnp.float32)
    n_pad8 = _ceil_to(num_samples, 8)
    tile = min(int(tile_n), n_pad8)                     # multiple of 8 by construction
    n_pad = _ceil_to(n_pad8, tile)
    if n_pad != num_samples:
        eps2d = jnp.pad(eps2d, ((0, n_pad - num_samples), (0, 0)))
    grid = (n_pad // tile,)

    z2d, logp = pl.pallas_call(
        affine_gaussian_kernel,
        out_shape=(
            jax.ShapeDtypeStruct((n_pad, d), jnp.float32),
            jax.ShapeDtypeStruct((n_pad, 1), jnp.float32),
        ),
        grid=grid,
        in_specs=[
            pl.BlockSpec(memory_space=pltpu.MemorySpace.SMEM),   # logp_const (1,)
            pl.BlockSpec((1, d), lambda i: (0, 0)),              # scale, VMEM-resident
            pl.BlockSpec((1, d), lambda i: (0, 0)),              # t,     VMEM-resident
            pl.BlockSpec((tile, d), lambda i: (i, 0)),           # eps tile
        ],
        out_specs=(
            pl.BlockSpec((tile, d), lambda i: (i, 0)),           # z tile
            pl.BlockSpec((tile, 1), lambda i: (i, 0)),           # log_p tile
        ),
        compiler_params=pltpu.CompilerParams(
            dimension_semantics=("parallel",),
            vmem_limit_bytes=32 * 1024 * 1024,
        ),
    )(logp_const, scale, t_full, eps2d)

    z = z2d[:num_samples].reshape((num_samples,) + shape)
    log_p = logp[:num_samples, 0]
    return z, log_p


def reference_forward(eps, s, t, log_scale=0.0):
    """Pure-JAX reference mirroring AffineGaussian.forward + AffineConstFlow exactly."""
    shape = eps.shape[1:]
    d = int(np.prod(shape))
    sum_dims = tuple(range(1, len(shape) + 1))
    z = np.exp(log_scale) * eps
    log_p = (-0.5 * d * np.log(2.0 * np.pi)
             - d * log_scale
             - 0.5 * jnp.sum(eps ** 2, axis=sum_dims))
    # AffineConstFlow.forward
    z_ = z * jnp.exp(s) + t
    batch_dims = [i for i, sz in enumerate(s.shape) if sz == 1]
    if len(batch_dims) > 1:
        prod_batch_dims = np.prod([z.shape[i] for i in batch_dims[1:]])
    else:
        prod_batch_dims = 1
    log_det = prod_batch_dims * jnp.sum(s)
    return z_, log_p - log_det


if __name__ == "__main__":
    # Module config: shape=(3, 8, 8) -> d=192, per-channel affine_shape=(3, 1, 1),
    # num_classes=None (non-class-conditional), temperature=None -> log_scale=0.0.
    shape = (3, 8, 8)
    affine_shape = (3, 1, 1)
    num_samples = 8

    key = jax.random.PRNGKey(0)
    k_s, k_t, k_eps = jax.random.split(key, 3)

    # AffineConstFlow params (zeros-init in PyTorch; random here so the check is non-trivial)
    s = 0.1 * jax.random.normal(k_s, (1,) + affine_shape, jnp.float32)
    t = jax.random.normal(k_t, (1,) + affine_shape, jnp.float32)

    # eps ~ N(0, I) drawn outside the kernel (torch.randn inside the PyTorch forward)
    eps = jax.random.normal(k_eps, (num_samples,) + shape, jnp.float32)

    z, log_p = affine_gaussian_forward(eps, s, t)
    jax.block_until_ready((z, log_p))

    z_ref, log_p_ref = reference_forward(eps, s, t)
    np.testing.assert_allclose(np.asarray(z), np.asarray(z_ref), rtol=1e-5, atol=1e-5)
    np.testing.assert_allclose(np.asarray(log_p), np.asarray(log_p_ref), rtol=1e-4, atol=1e-3)

    assert z.shape == (num_samples,) + shape and log_p.shape == (num_samples,)
    print("KERNEL_OK")
</pallas_src>

<mosaic_0001>
module attributes {stable_mosaic.version = 11 : i64} {
  func.func @affine_gaussian_kernel(%arg0: i32, %arg1: memref<1xf32, #tpu.memory_space<smem>>, %arg2: memref<1x192xf32, #tpu.memory_space<vmem>>, %arg3: memref<1x192xf32, #tpu.memory_space<vmem>>, %arg4: memref<8x192xf32, #tpu.memory_space<vmem>>, %arg5: memref<8x192xf32, #tpu.memory_space<vmem>>, %arg6: memref<8x1xf32, #tpu.memory_space<vmem>>) attributes {dimension_semantics = [#tpu.dimension_semantics<parallel>], iteration_bounds = array<i64: 1>, scalar_prefetch = 0 : i64, scratch_operands = 0 : i64, tpu.core_type = #tpu.core_type<tc>, window_params = [{transform_indices = @transform_0, window_bounds = array<i64: 1>}, {pipeline_mode = #tpu.pipeline_mode<synchronous>, transform_indices = @transform_1, window_bounds = array<i64: 1, 192>}, {pipeline_mode = #tpu.pipeline_mode<synchronous>, transform_indices = @transform_2, window_bounds = array<i64: 1, 192>}, {transform_indices = @transform_3, window_bounds = array<i64: 8, 192>}, {transform_indices = @transform_4, window_bounds = array<i64: 8, 192>}, {transform_indices = @transform_5, window_bounds = array<i64: 8, 1>}]} {
    %c0 = arith.constant 0 : index
    %c0_0 = arith.constant 0 : index
    %0 = vector.load %arg4[%c0, %c0_0] : memref<8x192xf32, #tpu.memory_space<vmem>>, vector<8x192xf32>
    %c0_1 = arith.constant 0 : index
    %c0_2 = arith.constant 0 : index
    %1 = vector.load %arg2[%c0_1, %c0_2] : memref<1x192xf32, #tpu.memory_space<vmem>>, vector<1x192xf32>
    %2 = vector.broadcast %1 : vector<1x192xf32> to vector<8x192xf32>
    %3 = arith.mulf %0, %2 : vector<8x192xf32>
    %c0_3 = arith.constant 0 : index
    %c0_4 = arith.constant 0 : index
    %4 = vector.load %arg3[%c0_3, %c0_4] : memref<1x192xf32, #tpu.memory_space<vmem>>, vector<1x192xf32>
    %5 = vector.broadcast %4 : vector<1x192xf32> to vector<8x192xf32>
    %6 = arith.addf %3, %5 : vector<8x192xf32>
    %c0_5 = arith.constant 0 : index
    %c0_6 = arith.constant 0 : index
    %7 = vector.load %arg5[%c0_5, %c0_6] : memref<8x192xf32, #tpu.memory_space<vmem>>, vector<8x192xf32>
    tpu.vector_store %arg5[%c0_5, %c0_6], %6 {strides = array<i32>} : memref<8x192xf32, #tpu.memory_space<vmem>>, vector<8x192xf32>,
    %8 = arith.mulf %0, %0 : vector<8x192xf32>
    %cst = arith.constant dense<0.000000e+00> : vector<8xf32>
    %9 = vector.multi_reduction <add>, %8, %cst [1] : vector<8x192xf32> to vector<8xf32>
    %10 = vector.shape_cast %9 : vector<8xf32> to vector<8x1xf32>
    %c0_7 = arith.constant 0 : index
    %11 = memref.load %arg1[%c0_7] : memref<1xf32, #tpu.memory_space<smem>>
    %cst_8 = arith.constant 5.000000e-01 : f32
    %12 = vector.broadcast %cst_8 : f32 to vector<8x1xf32>
    %13 = arith.mulf %12, %10 : vector<8x1xf32>
    %14 = vector.broadcast %11 : f32 to vector<8x1xf32>
    %15 = arith.subf %14, %13 : vector<8x1xf32>
    %c0_9 = arith.constant 0 : index
    %c0_10 = arith.constant 0 : index
    %16 = vector.load %arg6[%c0_9, %c0_10] : memref<8x1xf32, #tpu.memory_space<vmem>>, vector<8x1xf32>
    tpu.vector_store %arg6[%c0_9, %c0_10], %15 {strides = array<i32>} : memref<8x1xf32, #tpu.memory_space<vmem>>, vector<8x1xf32>,
    return
  }
  func.func @transform_0(%arg0: i32) -> i32 {
    %c0_i32 = arith.constant 0 : i32
    %c0_i32_0 = arith.constant 0 : i32
    return %c0_i32 : i32
  }
  func.func @transform_1(%arg0: i32) -> (i32, i32) {
    %c0_i32 = arith.constant 0 : i32
    %c0_i32_0 = arith.constant 0 : i32
    %c0_i32_1 = arith.constant 0 : i32
    return %c0_i32, %c0_i32_0 : i32, i32
  }
  func.func @transform_2(%arg0: i32) -> (i32, i32) {
    %c0_i32 = arith.constant 0 : i32
    %c0_i32_0 = arith.constant 0 : i32
    %c0_i32_1 = arith.constant 0 : i32
    return %c0_i32, %c0_i32_0 : i32, i32
  }
  func.func @transform_3(%arg0: i32) -> (i32, i32) {
    %c0_i32 = arith.constant 0 : i32
    %c0_i32_0 = arith.constant 0 : i32
    return %arg0, %c0_i32 : i32, i32
  }
  func.func @transform_4(%arg0: i32) -> (i32, i32) {
    %c0_i32 = arith.constant 0 : i32
    %c0_i32_0 = arith.constant 0 : i32
    return %arg0, %c0_i32 : i32, i32
  }
  func.func @transform_5(%arg0: i32) -> (i32, i32) {
    %c0_i32 = arith.constant 0 : i32
    %c0_i32_0 = arith.constant 0 : i32
    return %arg0, %c0_i32 : i32, i32
  }
}

</mosaic_0001>

<bundles_post_ra>
// kernel: affine_gaussian_forward.1
= control target key start
LH: loop header
LB: loop body
LE: loop exit
PB: predicated region body
PF: predicated region fallthrough
CT: control target
= control target key end

     0   :  { %v24_v0 = vlaneseq  ;;  %vm51_vm0 = vcmask 523264   ;;  %vm63_vm1 = vcmask 7168   ;;  %s129_s1 = inlined_call_operand.vmem [shape: f32[1,192], index: 1, kind: input, shape index: {}]   ;;  %s130_s2 = inlined_call_operand.vmem [shape: f32[1,192], index: 2, kind: input, shape index: {}]   ;;  %s131_s3 = inlined_call_operand.vmem [shape: f32[8,192], index: 3, kind: input, shape index: {}]   ;;  %s132_s4 = inlined_call_operand.vmem [shape: f32[8,192], index: 4, kind: output, shape index: {0}]   ;;  %s133_s0 = inlined_call_operand.<no memory space> [shape: f32[1], index: 0, kind: input, shape index: {}]   ;;  %s134_s5 = inlined_call_operand.vmem [shape: f32[8,1], index: 5, kind: output, shape index: {1}]  }
   0x1   :  { %v20_v1 = vld [vmem:[%s131_s3] sm:$0xff]  ;;  %v21_v2 = vld [vmem:[%s131_s3 + $0x8] sm:$0xff]  ;;  %v61_v21 = vstv %s133_s0 }
   0x2   :  { %v25_v3 = vshrl.u32 %v24_v0, 7  ;;  %v53_v4 = vmul.f32 %v20_v1, %v20_v1  ;;  %v54_v5 = vmul.f32 %v21_v2, %v21_v2  ;;  %v22_v6 = vld [vmem:[%s129_s1] sm:$0x3] }
   0x3   :  { %v36_v7 = vld [vmem:[%s130_s2] sm:$0x3] }
   0x4   :  { %v26_v8 = vsub.s32 0, %v25_v3  ;;  %v30_v9 = vsub.s32 1, %v25_v3  ;;  %v55_v10 = vsel %vm51_vm0, %v54_v5, 0.0 }
   0x5   :  { %v56_v11 = vadd.f32 %v55_v10, %v53_v4 }
   0x6   :  { %v27_v12 = vrot.slane %v22_v6, %v26_v8  ;;  %v31_v13 = vrot.slane %v22_v6, %v30_v9  ;;  %v41_v14 = vrot.slane %v36_v7, %v26_v8  ;;  %v45_v15 = vrot.slane %v36_v7, %v30_v9 }
   0x7   :  { %57 = vadd.xlane.f32.xlu0 %v56_v11 }
   0x8   :  { %v34_v16 = vmul.f32 %v27_v12, %v20_v1  ;;  %v35_v17 = vmul.f32 %v31_v13, %v21_v2 }
   0xa   :  { %v48_v18 = vadd.f32 %v41_v14, %v34_v16  ;;  %v49_v19 = vadd.f32 %v45_v15, %v35_v17 }
   0xc   :  { %50 = vst [vmem:[%s132_s4] sm:$0xff] %v48_v18  ;;  %52 = vst.msk [vmem:[%s132_s4 + $0x8] sm:$0xff] %vm51_vm0, %v49_v19 }
  0x94   :  { %v58_v20 = vpop.xlane.xlu0 %57 }
  0x95   :  { %v60_v22 = vmul.f32 0.5, %v58_v20 }
  0x97   :  { %v62_v23 = vsub.f32 %v61_v21, %v60_v22 }
  0x99   :  { %64 = vst.msk [vmem:[%s134_s5] sm:$0xff] %vm63_vm1, %v62_v23 }

</bundles_post_ra>
